<compile_context>
chip_gen: v5e
topology: v5e:2x2
jax: 0.10.0
libtpu: 0.0.40
codegen_flags: <defaults>
</compile_context>

<pallas_src>
import functools

import jax
import jax.numpy as jnp
import numpy as np
from jax.experimental import pallas as pl
from jax.experimental.pallas import tpu as pltpu


def _round_up(x, m):
    return (x + m - 1) // m * m


# ----------------------------------------------------------------------------
# Pallas kernel: single fused (diag | proc) linear head, lane-dense output.
# ----------------------------------------------------------------------------
def _heads_kernel(pe_ref, w_ref, b_ref, out_ref):
    # pe_ref : [tb, D_in]   bf16
    # w_ref  : [D_in, Dpad] bf16 (zero-padded lanes)
    # b_ref  : [1, Dpad]    f32
    # out_ref: [tb, Dpad]   f32
    out_ref[...] = (
        jnp.dot(pe_ref[...], w_ref[...], preferred_element_type=jnp.float32)
        + b_ref[...]
    ).astype(out_ref.dtype)


@jax.jit
def _fused_heads(prof_emb, w_cat, b_cat):
    """prof_emb [B, D_in] f32, w_cat [D_in, d_cat], b_cat [1, d_cat] ->
    [B, d_pad] f32 where d_pad = round_up(max(d_cat, 128), 128)."""
    B, d_in = prof_emb.shape
    d_cat = w_cat.shape[1]
    d_pad = _round_up(max(d_cat, 128), 128)

    # Lane-dense output: pad fused weight/bias columns with zeros up to 128*k.
    if d_pad != d_cat:
        w_cat = jnp.pad(w_cat, ((0, 0), (0, d_pad - d_cat)))
        b_cat = jnp.pad(b_cat, ((0, 0), (0, d_pad - d_cat)))

    # bf16 MXU fast path; bias / accumulation stay f32.
    pe = prof_emb.astype(jnp.bfloat16)
    w = w_cat.astype(jnp.bfloat16)
    b = b_cat.astype(jnp.float32)

    # Batch tiling: large tiles to amortize ~0.35us/grid-step, multiple of 16
    # (bf16 sublane packing), and >= 2 grid steps when B allows (v7x 2 TCs).
    if B <= 16:
        block_b = _round_up(B, 16)
    else:
        block_b = min(512, _round_up(pl.cdiv(B, 2), 16))
    B_pad = _round_up(B, block_b)
    if B_pad != B:
        pe = jnp.pad(pe, ((0, B_pad - B), (0, 0)))

    grid = (B_pad // block_b,)

    cost = pl.CostEstimate(
        flops=2 * B_pad * d_in * d_pad,
        transcendentals=0,
        bytes_accessed=(
            B_pad * d_in * 2          # bf16 activations
            + d_in * d_pad * 2        # bf16 fused weight
            + d_pad * 4               # f32 bias
            + B_pad * d_pad * 4       # f32 output
        ),
    )

    out = pl.pallas_call(
        _heads_kernel,
        out_shape=jax.ShapeDtypeStruct((B_pad, d_pad), jnp.float32),
        grid_spec=pltpu.PrefetchScalarGridSpec(
            num_scalar_prefetch=0,
            grid=grid,
            in_specs=[
                pl.BlockSpec((block_b, d_in), lambda i: (i, 0)),  # activations
                pl.BlockSpec((d_in, d_pad), lambda i: (0, 0)),    # fused W^T
                pl.BlockSpec((1, d_pad), lambda i: (0, 0)),       # fused bias
            ],
            out_specs=pl.BlockSpec((block_b, d_pad), lambda i: (i, 0)),
        ),
        compiler_params=pltpu.CompilerParams(
            dimension_semantics=("parallel",),
        ),
        cost_estimate=cost,
    )(pe, w, b)

    return out[:B]


# ----------------------------------------------------------------------------
# ProfileEncoder in JAX (params + forward using the Pallas kernel)
# ----------------------------------------------------------------------------
def init_profile_encoder_params(key, vocab_sizes, emb_dim, prompt_num=1):
    profile_num = len(vocab_sizes)
    d_in = profile_num * emb_dim
    d_out = emb_dim * prompt_num
    keys = jax.random.split(key, profile_num + 6)

    # nn.Embedding default init: N(0, 1)
    emb_tables = [
        jax.random.normal(keys[i], (v, emb_dim), dtype=jnp.float32)
        for i, v in enumerate(vocab_sizes)
    ]
    # Stacked table + per-column offsets so the forward gather is a single take.
    emb_stacked = jnp.concatenate(emb_tables, axis=0)
    emb_offsets = jnp.asarray(
        np.concatenate([[0], np.cumsum(vocab_sizes)[:-1]]), dtype=jnp.int32
    )

    # nn.Linear default init: U(-1/sqrt(fan_in), 1/sqrt(fan_in)) for W and b.
    bound = 1.0 / float(np.sqrt(d_in))

    def lin(kw, kb):
        w = jax.random.uniform(kw, (d_out, d_in), jnp.float32, -bound, bound)
        b = jax.random.uniform(kb, (d_out,), jnp.float32, -bound, bound)
        return w, b

    k = profile_num
    med_w, med_b = lin(keys[k + 0], keys[k + 1])   # defined but unused (as in PyTorch forward)
    proc_w, proc_b = lin(keys[k + 2], keys[k + 3])
    diag_w, diag_b = lin(keys[k + 4], keys[k + 5])

    return {
        "emb_tables": emb_tables,
        "emb_stacked": emb_stacked,
        "emb_offsets": emb_offsets,
        "med": (med_w, med_b),
        "proc": (proc_w, proc_b),
        "diag": (diag_w, diag_b),
    }


def profile_encoder_forward(params, x):
    """x: int32 [B, profile_num] -> (diag, proc, diag) each [B, emb_dim*prompt_num]."""
    B, P = x.shape
    emb_dim = params["emb_stacked"].shape[1]

    # Single fused gather: offset each column into the stacked table, one take,
    # reshape reproduces concat(emb_0..emb_{P-1}, axis=-1) row order exactly.
    flat_idx = (x + params["emb_offsets"][None, :]).reshape(-1)
    prof_emb = jnp.take(params["emb_stacked"], flat_idx, axis=0).reshape(B, P * emb_dim)

    diag_w, diag_b = params["diag"]
    proc_w, proc_b = params["proc"]
    d_out = diag_w.shape[0]

    # Fuse both heads into one [D_in, 2*d_out] matmul.
    w_cat = jnp.concatenate([diag_w.T, proc_w.T], axis=1)     # [D_in, 2*d_out]
    b_cat = jnp.concatenate([diag_b, proc_b])[None, :]        # [1, 2*d_out]

    fused = _fused_heads(prof_emb, w_cat, b_cat)              # [B, d_pad]
    diag_out = fused[:, :d_out]
    proc_out = fused[:, d_out:2 * d_out]

    # Matches PyTorch: (diag_head(prof_emb), proc_head(prof_emb), diag_head(prof_emb))
    return diag_out, proc_out, diag_out


# ----------------------------------------------------------------------------
# Reference (pure jnp, f32) for a correctness check
# ----------------------------------------------------------------------------
def _reference_forward(params, x):
    profile_vecs = [
        jnp.take(tbl, x[:, i], axis=0) for i, tbl in enumerate(params["emb_tables"])
    ]
    prof_emb = jnp.concatenate(profile_vecs, axis=-1)
    diag_w, diag_b = params["diag"]
    proc_w, proc_b = params["proc"]
    diag = prof_emb @ diag_w.T + diag_b
    proc = prof_emb @ proc_w.T + proc_b
    return diag, proc, diag


if __name__ == "__main__":
    # Small, deterministic configuration consistent with the module.
    B = 8
    emb_dim = 32
    prompt_num = 1
    vocab_sizes = [11, 13, 17, 19]            # profile_num = 4 -> D_in = 128
    profile_num = len(vocab_sizes)

    key = jax.random.PRNGKey(0)
    pkey, xkey = jax.random.split(key)
    params = init_profile_encoder_params(pkey, vocab_sizes, emb_dim, prompt_num)

    # x: [B, profile_num] integer indices, each column bounded by its vocab size.
    xcols = []
    for i, v in enumerate(vocab_sizes):
        xcols.append(
            jax.random.randint(jax.random.fold_in(xkey, i), (B, 1), 0, v, dtype=jnp.int32)
        )
    x = jnp.concatenate(xcols, axis=1)        # [8, 4]

    diag, proc, diag2 = profile_encoder_forward(params, x)
    jax.block_until_ready((diag, proc, diag2))

    # Sanity check against pure-JAX f32 reference (kernel uses bf16 MXU inputs,
    # f32 accumulation -> loosened tolerance per that choice).
    r_diag, r_proc, _ = _reference_forward(params, x)
    assert diag.shape == (B, emb_dim * prompt_num)
    assert proc.shape == (B, emb_dim * prompt_num)
    assert jnp.allclose(diag, r_diag, atol=3e-2, rtol=3e-2)
    assert jnp.allclose(proc, r_proc, atol=3e-2, rtol=3e-2)
    assert jnp.array_equal(diag, diag2)

    print("KERNEL_OK")
</pallas_src>

<mosaic_0001>
module attributes {stable_mosaic.version = 11 : i64} {
  func.func @_heads_kernel(%arg0: i32, %arg1: memref<16x128xbf16, #tpu.memory_space<vmem>>, %arg2: memref<128x128xbf16, #tpu.memory_space<vmem>>, %arg3: memref<1x128xf32, #tpu.memory_space<vmem>>, %arg4: memref<16x128xf32, #tpu.memory_space<vmem>>) attributes {dimension_semantics = [#tpu.dimension_semantics<parallel>], iteration_bounds = array<i64: 1>, scalar_prefetch = 0 : i64, scratch_operands = 0 : i64, tpu.core_type = #tpu.core_type<tc>, window_params = [{transform_indices = @transform_0, window_bounds = array<i64: 16, 128>}, {pipeline_mode = #tpu.pipeline_mode<synchronous>, transform_indices = @transform_1, window_bounds = array<i64: 128, 128>}, {pipeline_mode = #tpu.pipeline_mode<synchronous>, transform_indices = @transform_2, window_bounds = array<i64: 1, 128>}, {transform_indices = @transform_3, window_bounds = array<i64: 16, 128>}]} {
    %c0 = arith.constant 0 : index
    %c0_0 = arith.constant 0 : index
    %0 = vector.load %arg1[%c0, %c0_0] : memref<16x128xbf16, #tpu.memory_space<vmem>>, vector<16x128xbf16>
    %c0_1 = arith.constant 0 : index
    %c0_2 = arith.constant 0 : index
    %1 = vector.load %arg2[%c0_1, %c0_2] : memref<128x128xbf16, #tpu.memory_space<vmem>>, vector<128x128xbf16>
    %cst = arith.constant dense<0.000000e+00> : vector<16x128xf32>
    %2 = tpu.matmul %0, %1, %cst {dimension_numbers = #tpu.dot_dimension_numbers<[1], [0], [0], [1], [0, 0, 1, 1], [], []>} : vector<16x128xbf16>, vector<128x128xbf16>, vector<16x128xf32> -> vector<16x128xf32>
    %c0_3 = arith.constant 0 : index
    %c0_4 = arith.constant 0 : index
    %3 = vector.load %arg3[%c0_3, %c0_4] : memref<1x128xf32, #tpu.memory_space<vmem>>, vector<1x128xf32>
    %4 = vector.broadcast %3 : vector<1x128xf32> to vector<16x128xf32>
    %5 = arith.addf %2, %4 : vector<16x128xf32>
    %c0_5 = arith.constant 0 : index
    %c0_6 = arith.constant 0 : index
    %6 = vector.load %arg4[%c0_5, %c0_6] : memref<16x128xf32, #tpu.memory_space<vmem>>, vector<16x128xf32>
    tpu.vector_store %arg4[%c0_5, %c0_6], %5 {strides = array<i32>} : memref<16x128xf32, #tpu.memory_space<vmem>>, vector<16x128xf32>,
    return
  }
  func.func @transform_0(%arg0: i32) -> (i32, i32) {
    %c0_i32 = arith.constant 0 : i32
    %c0_i32_0 = arith.constant 0 : i32
    return %arg0, %c0_i32 : i32, i32
  }
  func.func @transform_1(%arg0: i32) -> (i32, i32) {
    %c0_i32 = arith.constant 0 : i32
    %c0_i32_0 = arith.constant 0 : i32
    %c0_i32_1 = arith.constant 0 : i32
    return %c0_i32, %c0_i32_0 : i32, i32
  }
  func.func @transform_2(%arg0: i32) -> (i32, i32) {
    %c0_i32 = arith.constant 0 : i32
    %c0_i32_0 = arith.constant 0 : i32
    %c0_i32_1 = arith.constant 0 : i32
    return %c0_i32, %c0_i32_0 : i32, i32
  }
  func.func @transform_3(%arg0: i32) -> (i32, i32) {
    %c0_i32 = arith.constant 0 : i32
    %c0_i32_0 = arith.constant 0 : i32
    return %arg0, %c0_i32 : i32, i32
  }
}

</mosaic_0001>

<bundles_post_ra>
// kernel: _fused_heads.1
= control target key start
LH: loop header
LB: loop body
LE: loop exit
PB: predicated region body
PF: predicated region fallthrough
CT: control target
= control target key end

     0   :  { %s212_s1 = inlined_call_operand.vmem [shape: bf16[128,128], index: 1, kind: input, shape index: {}]   ;;  %s213_s2 = inlined_call_operand.vmem [shape: f32[1,128], index: 2, kind: input, shape index: {}]   ;;  %s214_s0 = inlined_call_operand.vmem [shape: bf16[16,128], index: 0, kind: input, shape index: {}]   ;;  %s215_s3 = inlined_call_operand.vmem [shape: f32[16,128], index: 3, kind: output, shape index: {}]  }
   0x1   :  { %v154_v0 = vld [vmem:[%s212_s1 + $0x38] sm:$0xff]  ;;  %v153_v1 = vld [vmem:[%s212_s1 + $0x30] sm:$0xff]  ;;  %v152_v2 = vld [vmem:[%s212_s1 + $0x28] sm:$0xff] }
   0x2   :  { %90 = vmatpush.bf16.msra.mxu0 %v154_v0  ;;  %v151_v3 = vld [vmem:[%s212_s1 + $0x20] sm:$0xff]  ;;  %v150_v4 = vld [vmem:[%s212_s1 + $0x18] sm:$0xff]  ;;  %v149_v5 = vld [vmem:[%s212_s1 + $0x10] sm:$0xff] }
   0x3   :  { %v148_v6 = vld [vmem:[%s212_s1 + $0x8] sm:$0xff]  ;;  %v147_v7 = vld [vmem:[%s212_s1] sm:$0xff] }
   0x4   :  { %v146_v8 = vld [vmem:[%s214_s0] sm:$0xff] }
   0x5   :  { %v155_v9 = vld [vmem:[%s213_s2] ss:$0 sm:$0xff] }
   0x6   :  { %91 = vmatpush.bf16.msra.mxu0 %v153_v1 }
   0xa   :  { %92 = vmatpush.bf16.msra.mxu0 %v152_v2 }
   0xe   :  { %93 = vmatpush.bf16.msra.mxu0 %v151_v3 }
  0x12   :  { %94 = vmatpush.bf16.msra.mxu0 %v150_v4 }
  0x16   :  { %95 = vmatpush.bf16.msra.mxu0 %v149_v5 }
  0x1a   :  { %96 = vmatpush.bf16.msra.mxu0 %v148_v6 }
  0x1e   :  { %97 = vmatpush.bf16.msra.mxu0 %v147_v7 }
  0x21   :  { %98 = vmatmul.bf16.vlgmr.msra.gmra.mxu0 %v146_v8 }
  0x9e   :  { %v99_v10 = vpop.f32.mrf.mxu0 }
  0x9f   :  { %v100_v11 = vadd.f32 %v155_v9, %v99_v10 }
  0xa1   :  { %104 = vst [vmem:[%s215_s3] sm:$0xff] %v100_v11 }
  0xa6   :  { %v101_v12 = vpop.f32.mrf.mxu0 }
  0xa7   :  { %v102_v13 = vadd.f32 %v155_v9, %v101_v12 }
  0xa9   :  { %105 = vst [vmem:[%s215_s3 + $0x8] sm:$0xff] %v102_v13 }

</bundles_post_ra>
